<compile_context>
chip_gen: v6e
topology: v6e:2x2x1
jax: 0.10.0
libtpu: 0.0.40
codegen_flags: <defaults>
</compile_context>

<pallas_src>
import functools

import jax
import jax.numpy as jnp
from jax.experimental import pallas as pl
from jax.experimental.pallas import tpu as pltpu


def _ffn_kernel(x_ref, w1_ref, b1_ref, w2_ref, b2_ref, o_ref, *, th):
    # x_ref : (TM, D)   row tile of the flattened input (caller dtype)
    # w1_ref: (D,  Hp)  first projection weight, compute dtype (resident)
    # b1_ref: (1,  Hp)  f32 (resident)
    # w2_ref: (Hp, D)   second projection weight, compute dtype (resident)
    # b2_ref: (1,  D)   f32 (resident)
    # o_ref : (TM, D)   row tile of the output
    cdt = w1_ref.dtype
    tm = x_ref.shape[0]
    hp = w1_ref.shape[1]
    d = w2_ref.shape[1]

    x = x_ref[...].astype(cdt)  # bf16 LHS for the MXU, cast in VMEM

    acc = jnp.zeros((tm, d), jnp.float32)
    # H-chunked: only a (TM, th) hidden slab is live at a time.
    for start in range(0, hp, th):
        end = min(start + th, hp)
        # ---- Linear 1 (f32 accumulation on the MXU) ----
        h = jnp.dot(x, w1_ref[:, start:end], preferred_element_type=jnp.float32)
        h = h + b1_ref[:, start:end].astype(jnp.float32)
        # ---- Swish fused in the epilogue (f32, exp on the EUP) ----
        h = h * jax.nn.sigmoid(h)
        # ---- Linear 2, accumulated in f32 ----
        acc = acc + jnp.dot(h.astype(cdt), w2_ref[start:end, :],
                            preferred_element_type=jnp.float32)

    acc = acc + b2_ref[...].astype(jnp.float32)
    o_ref[...] = acc.astype(o_ref.dtype)


def _resident_spec(block_shape):
    """Constant-index operand: fetched once, kept in VMEM, single-buffered."""
    idx = lambda i: (0,) * len(block_shape)
    try:
        return pl.BlockSpec(block_shape, idx, pipeline_mode=pl.Buffered(1))
    except (TypeError, AttributeError):  # older jax without pipeline_mode
        return pl.BlockSpec(block_shape, idx)


def feed_forward_pallas(x, w1, b1, w2, b2, *, tm=512,
                        compute_dtype=jnp.bfloat16):
    """y = Swish(x @ w1 + b1) @ w2 + b2 over the last axis of x.

    Matmuls run with bf16 operands (native MXU path) and f32 accumulation.
    """
    d = x.shape[-1]
    h_dim = w1.shape[-1]
    assert w1.shape == (d, h_dim)
    assert w2.shape == (h_dim, d)
    assert b1.shape[-1] == h_dim and b2.shape[-1] == d

    orig_shape = x.shape
    x2d = x.reshape(-1, d)  # free row-major view
    m = x2d.shape[0]
    out_dtype = x.dtype

    # --- pad hidden dim to a multiple of 128 (weights only; zero columns
    # --- contribute exactly zero through Swish and the second matmul) ---
    hp = ((h_dim + 127) // 128) * 128
    if hp != h_dim:
        w1 = jnp.pad(w1, ((0, 0), (0, hp - h_dim)))
        b1 = jnp.pad(b1, ((0, hp - h_dim),))
        w2 = jnp.pad(w2, ((0, hp - h_dim), (0, 0)))

    # Weights feed the MXU in bf16; biases stay f32 (added post-accumulation).
    w1c = w1.astype(compute_dtype)
    w2c = w2.astype(compute_dtype)
    b1_2d = b1.reshape(1, hp).astype(jnp.float32)
    b2_2d = b2.reshape(1, d).astype(jnp.float32)

    # Row tile: multiple of 8 sublanes, no larger than (padded) M.
    m_round = ((m + 7) // 8) * 8
    tm = ((max(8, min(tm, m_round)) + 7) // 8) * 8
    grid = (pl.cdiv(m, tm),)

    # Hidden chunk for the in-kernel loop (multiple of 128 since hp is).
    th = hp if hp <= 512 else 512

    # --- explicit VMEM budget: weights + biases + 2x streaming tiles +
    # --- chunked hidden slab + accumulator, with ~50% headroom ---
    cbytes = jnp.dtype(compute_dtype).itemsize
    xbytes = jnp.dtype(x.dtype).itemsize
    obytes = jnp.dtype(out_dtype).itemsize
    weight_bytes = (d * hp + hp * d) * cbytes + (hp + d) * 4
    stream_bytes = 2 * tm * d * xbytes + 2 * tm * d * obytes
    interm_bytes = tm * th * (4 + cbytes) + tm * d * 4
    needed = weight_bytes + stream_bytes + interm_bytes
    vmem_limit = int(min(max(needed * 1.5, 32 * 1024 * 1024), 64 * 1024 * 1024))

    cost = pl.CostEstimate(
        flops=4 * m * d * hp,                      # two (M,D,H) matmuls
        transcendentals=m * hp,                    # sigmoid exp
        bytes_accessed=m * d * (xbytes + obytes) + weight_bytes,
    )

    out2d = pl.pallas_call(
        functools.partial(_ffn_kernel, th=th),
        out_shape=jax.ShapeDtypeStruct((m, d), out_dtype),
        grid_spec=pltpu.PrefetchScalarGridSpec(
            num_scalar_prefetch=0,
            grid=grid,
            in_specs=[
                # activations: streamed row tiles (default double-buffered)
                pl.BlockSpec((tm, d), lambda i: (i, 0)),
                # weights / biases: constant index -> resident, single-buffered
                _resident_spec((d, hp)),
                _resident_spec((1, hp)),
                _resident_spec((hp, d)),
                _resident_spec((1, d)),
            ],
            out_specs=pl.BlockSpec((tm, d), lambda i: (i, 0)),
        ),
        compiler_params=pltpu.CompilerParams(
            dimension_semantics=("parallel",),   # independent row tiles
            vmem_limit_bytes=vmem_limit,
        ),
        cost_estimate=cost,
    )(x2d, w1c, b1_2d, w2c, b2_2d)

    return out2d.reshape(orig_shape)


if __name__ == "__main__":
    key = jax.random.PRNGKey(0)
    k_x, k_w1, k_b1, k_w2, k_b2 = jax.random.split(key, 5)

    # Small conformer-style shapes: (batch, seq, dim), mult=4.
    B, T, DIM, MULT = 2, 16, 64, 4
    HID = DIM * MULT

    x = jax.random.normal(k_x, (B, T, DIM), dtype=jnp.float32)
    w1 = jax.random.normal(k_w1, (DIM, HID), dtype=jnp.float32) * 0.05
    b1 = jax.random.normal(k_b1, (HID,), dtype=jnp.float32) * 0.05
    w2 = jax.random.normal(k_w2, (HID, DIM), dtype=jnp.float32) * 0.05
    b2 = jax.random.normal(k_b2, (DIM,), dtype=jnp.float32) * 0.05

    y = feed_forward_pallas(x, w1, b1, w2, b2)
    y = jax.block_until_ready(y)

    # Plain-JAX f32 reference (same math as the PyTorch module in eval mode).
    h_ref = jnp.einsum("btd,dh->bth", x, w1) + b1
    h_ref = h_ref * jax.nn.sigmoid(h_ref)
    y_ref = jnp.einsum("bth,hd->btd", h_ref, w2) + b2

    assert y.shape == y_ref.shape, (y.shape, y_ref.shape)
    # bf16 MXU operands with f32 accumulation -> compare at a bf16-level
    # tolerance against the pure-f32 reference.
    max_err = float(jnp.max(jnp.abs(y.astype(jnp.float32) - y_ref)))
    assert jnp.allclose(y.astype(jnp.float32), y_ref, atol=2e-2, rtol=2e-2), max_err

    print("KERNEL_OK")
</pallas_src>

<mosaic_0001>
module attributes {stable_mosaic.version = 11 : i64} {
  func.func @_ffn_kernel(%arg0: i32, %arg1: memref<32x64xf32, #tpu.memory_space<vmem>>, %arg2: memref<64x256xbf16, #tpu.memory_space<vmem>>, %arg3: memref<1x256xf32, #tpu.memory_space<vmem>>, %arg4: memref<256x64xbf16, #tpu.memory_space<vmem>>, %arg5: memref<1x64xf32, #tpu.memory_space<vmem>>, %arg6: memref<32x64xf32, #tpu.memory_space<vmem>>) attributes {dimension_semantics = [#tpu.dimension_semantics<parallel>], iteration_bounds = array<i64: 1>, scalar_prefetch = 0 : i64, scratch_operands = 0 : i64, tpu.core_type = #tpu.core_type<tc>, window_params = [{transform_indices = @transform_0, window_bounds = array<i64: 32, 64>}, {pipeline_mode = #tpu.pipeline_mode<synchronous>, transform_indices = @transform_1, window_bounds = array<i64: 64, 256>}, {pipeline_mode = #tpu.pipeline_mode<synchronous>, transform_indices = @transform_2, window_bounds = array<i64: 1, 256>}, {pipeline_mode = #tpu.pipeline_mode<synchronous>, transform_indices = @transform_3, window_bounds = array<i64: 256, 64>}, {pipeline_mode = #tpu.pipeline_mode<synchronous>, transform_indices = @transform_4, window_bounds = array<i64: 1, 64>}, {transform_indices = @transform_5, window_bounds = array<i64: 32, 64>}]} {
    %c0 = arith.constant 0 : index
    %c0_0 = arith.constant 0 : index
    %0 = vector.load %arg1[%c0, %c0_0] : memref<32x64xf32, #tpu.memory_space<vmem>>, vector<32x64xf32>
    %1 = arith.truncf %0 : vector<32x64xf32> to vector<32x64xbf16>
    %cst = arith.constant 0.000000e+00 : f32
    %2 = vector.broadcast %cst : f32 to vector<32x64xf32>
    %c0_1 = arith.constant 0 : index
    %c0_2 = arith.constant 0 : index
    %3 = vector.load %arg2[%c0_1, %c0_2] : memref<64x256xbf16, #tpu.memory_space<vmem>>, vector<64x256xbf16>
    %cst_3 = arith.constant dense<0.000000e+00> : vector<32x256xf32>
    %4 = tpu.matmul %1, %3, %cst_3 {dimension_numbers = #tpu.dot_dimension_numbers<[1], [0], [0], [1], [0, 0, 1, 1], [], []>} : vector<32x64xbf16>, vector<64x256xbf16>, vector<32x256xf32> -> vector<32x256xf32>
    %c0_4 = arith.constant 0 : index
    %c0_5 = arith.constant 0 : index
    %5 = vector.load %arg3[%c0_4, %c0_5] : memref<1x256xf32, #tpu.memory_space<vmem>>, vector<1x256xf32>
    %6 = vector.broadcast %5 : vector<1x256xf32> to vector<32x256xf32>
    %7 = arith.addf %4, %6 : vector<32x256xf32>
    %8 = arith.negf %7 : vector<32x256xf32>
    %9 = math.exp %8 : vector<32x256xf32>
    %cst_6 = arith.constant 1.000000e+00 : f32
    %10 = vector.broadcast %cst_6 : f32 to vector<32x256xf32>
    %11 = arith.addf %10, %9 : vector<32x256xf32>
    %12 = arith.divf %10, %11 : vector<32x256xf32>
    %13 = arith.mulf %7, %12 : vector<32x256xf32>
    %14 = arith.truncf %13 : vector<32x256xf32> to vector<32x256xbf16>
    %c0_7 = arith.constant 0 : index
    %c0_8 = arith.constant 0 : index
    %15 = vector.load %arg4[%c0_7, %c0_8] : memref<256x64xbf16, #tpu.memory_space<vmem>>, vector<256x64xbf16>
    %cst_9 = arith.constant dense<0.000000e+00> : vector<32x64xf32>
    %16 = tpu.matmul %14, %15, %cst_9 {dimension_numbers = #tpu.dot_dimension_numbers<[1], [0], [0], [1], [0, 0, 1, 1], [], []>} : vector<32x256xbf16>, vector<256x64xbf16>, vector<32x64xf32> -> vector<32x64xf32>
    %17 = arith.addf %2, %16 : vector<32x64xf32>
    %c0_10 = arith.constant 0 : index
    %c0_11 = arith.constant 0 : index
    %18 = vector.load %arg5[%c0_10, %c0_11] : memref<1x64xf32, #tpu.memory_space<vmem>>, vector<1x64xf32>
    %19 = vector.broadcast %18 : vector<1x64xf32> to vector<32x64xf32>
    %20 = arith.addf %17, %19 : vector<32x64xf32>
    %c0_12 = arith.constant 0 : index
    %c0_13 = arith.constant 0 : index
    %21 = vector.load %arg6[%c0_12, %c0_13] : memref<32x64xf32, #tpu.memory_space<vmem>>, vector<32x64xf32>
    tpu.vector_store %arg6[%c0_12, %c0_13], %20 {strides = array<i32>} : memref<32x64xf32, #tpu.memory_space<vmem>>, vector<32x64xf32>,
    return
  }
  func.func @transform_0(%arg0: i32) -> (i32, i32) {
    %c0_i32 = arith.constant 0 : i32
    %c0_i32_0 = arith.constant 0 : i32
    return %arg0, %c0_i32 : i32, i32
  }
  func.func @transform_1(%arg0: i32) -> (i32, i32) {
    %c0_i32 = arith.constant 0 : i32
    %c0_i32_0 = arith.constant 0 : i32
    %c0_i32_1 = arith.constant 0 : i32
    return %c0_i32, %c0_i32_0 : i32, i32
  }
  func.func @transform_2(%arg0: i32) -> (i32, i32) {
    %c0_i32 = arith.constant 0 : i32
    %c0_i32_0 = arith.constant 0 : i32
    %c0_i32_1 = arith.constant 0 : i32
    return %c0_i32, %c0_i32_0 : i32, i32
  }
  func.func @transform_3(%arg0: i32) -> (i32, i32) {
    %c0_i32 = arith.constant 0 : i32
    %c0_i32_0 = arith.constant 0 : i32
    %c0_i32_1 = arith.constant 0 : i32
    return %c0_i32, %c0_i32_0 : i32, i32
  }
  func.func @transform_4(%arg0: i32) -> (i32, i32) {
    %c0_i32 = arith.constant 0 : i32
    %c0_i32_0 = arith.constant 0 : i32
    %c0_i32_1 = arith.constant 0 : i32
    return %c0_i32, %c0_i32_0 : i32, i32
  }
  func.func @transform_5(%arg0: i32) -> (i32, i32) {
    %c0_i32 = arith.constant 0 : i32
    %c0_i32_0 = arith.constant 0 : i32
    return %arg0, %c0_i32 : i32, i32
  }
}

</mosaic_0001>

<bundles_post_ra>
// kernel: tpu_custom_call.1
= control target key start
LH: loop header
LB: loop body
LE: loop exit
PB: predicated region body
PF: predicated region fallthrough
CT: control target
= control target key end

     0   :  { %v561_v2 = vmov 0   ;;  %vm88_vm0 = vcmask 523264   ;;  %s694_s0 = inlined_call_operand.vmem [shape: f32[32,64], index: 0, kind: input, shape index: {}]   ;;  %s695_s1 = inlined_call_operand.vmem [shape: bf16[64,256], index: 1, kind: input, shape index: {}]   ;;  %s696_s2 = inlined_call_operand.vmem [shape: f32[1,256], index: 2, kind: input, shape index: {}]   ;;  %s697_s3 = inlined_call_operand.vmem [shape: bf16[256,64], index: 3, kind: input, shape index: {}]   ;;  %s698_s4 = inlined_call_operand.vmem [shape: f32[1,64], index: 4, kind: input, shape index: {}]   ;;  %s699_s5 = inlined_call_operand.hbm [shape: f32[32,64], index: 5, kind: output, shape index: {}]  }
   0x1   :  { %v479_v0 = vld [vmem:[%s695_s1 + $0x34] ss:$8 sps:$4 sm:$0xff]   ;;  %v481_v1 = vld [vmem:[%s695_s1 + $0x30] ss:$8 sps:$4 sm:$0xff]   ;;  %127 = vmatprep.mubr.bf16.mxu0 %v561_v2  ;;  %v482_v3 = vld [vmem:[%s695_s1 + $0x24] ss:$8 sps:$4 sm:$0xff]  }
   0x2   :  { %103 = vmatprep.subr.bf16.mxu0 %v479_v0  ;;  %v484_v4 = vld [vmem:[%s695_s1 + $0x20] ss:$8 sps:$4 sm:$0xff]   ;;  %v485_v5 = vld [vmem:[%s695_s1 + $0x14] ss:$8 sps:$4 sm:$0xff]   ;;  %v487_v6 = vld [vmem:[%s695_s1 + $0x10] ss:$8 sps:$4 sm:$0xff]  }
   0x3   :  { %104 = vmatpush1.bf16.msra.mxu0 %v481_v1  ;;  %v488_v7 = vld [vmem:[%s695_s1 + $0x4] ss:$8 sps:$4 sm:$0xff]   ;;  %v490_v8 = vld [vmem:[%s695_s1] ss:$8 sps:$4 sm:$0xff]  }
   0x4   :  { %105 = vmatprep.subr.bf16.mxu0 %v482_v3  ;;  %v22_v9 = vld [vmem:[%s694_s0] sm:$0xff]  ;;  %v23_v10 = vld [vmem:[%s694_s0 + $0x8] sm:$0xff] }
   0x5   :  { %v26_v11 = vpack.c.bf16 %v23_v10, %v22_v9 }
   0x7   :  { %106 = vmatpush1.bf16.msra.mxu0 %v484_v4 }
   0x8   :  { %107 = vmatprep.subr.bf16.mxu0 %v485_v5 }
   0xb   :  { %108 = vmatpush1.bf16.msra.mxu0 %v487_v6 }
   0xc   :  { %109 = vmatprep.subr.bf16.mxu0 %v488_v7 }
   0xf   :  { %110 = vmatpush1.bf16.msra.mxu0 %v490_v8 }
  0x10   :  { %10 = vsyncpa [#allocation3], 0  ;;  %v24_v12 = vld [vmem:[%s694_s0 + $0x10] sm:$0xff]  ;;  %v25_v13 = vld [vmem:[%s694_s0 + $0x18] sm:$0xff]  ;;  %v38_v31 = vlaneseq  ;;  %s562_s23 = smov [#allocation2]  }
  0x11   :  { %v27_v14 = vpack.c.bf16 %v25_v13, %v24_v12  ;;  %v491_v15 = vld [vmem:[%s697_s3 + $0x78] sm:$0xff]   ;;  %v493_v17 = vld [vmem:[%s697_s3 + $0x70] sm:$0xff]   ;;  %v495_v19 = vld [vmem:[%s697_s3 + $0x68] sm:$0xff]   ;;  %s401_s0 = sshll.u32 %s562_s23, 4  ;;  %s402_s0 = int_to_ptr.vmem [resolvable:$true] %s401_s0 }
  0x12   :  { %420 = vmatmul.mubr.msk.bf16.vlgmr.msra.gmra.mxu0 %vm88_vm0, %v26_v11  ;;  %v492_v16 = vld [vmem:[%s697_s3 + $0x38] sm:$0xff]   ;;  %447 = vmatprep.subr.bf16.mxu1 %v491_v15  ;;  %v494_v18 = vld [vmem:[%s697_s3 + $0x30] sm:$0xff]   ;;  %v496_v20 = vld [vmem:[%s697_s3 + $0x28] sm:$0xff]   ;;  %v39_v32 = vshrl.u32 %v38_v31, 7  ;;  %p544_p1 = scmp.lt.s32.totalorder %s402_s0, %s402_s0 }
  0x13   :  { %137 = vmatprep.mubr.bf16.mxu0 %v561_v2  ;;  %448 = vmatpush3.bf16.msra.mxu1 %v492_v16  ;;  %v497_v21 = vld [vmem:[%s697_s3 + $0x60] sm:$0xff]   ;;  %v499_v23 = vld [vmem:[%s697_s3 + $0x58] sm:$0xff]   ;;  %v501_v25 = vld [vmem:[%s697_s3 + $0x50] sm:$0xff]  }
  0x14   :  { %449 = vmatprep.subr.bf16.mxu1 %v493_v17  ;;  %v498_v22 = vld [vmem:[%s697_s3 + $0x20] sm:$0xff]   ;;  %v500_v24 = vld [vmem:[%s697_s3 + $0x18] sm:$0xff]   ;;  %v502_v26 = vld [vmem:[%s697_s3 + $0x10] sm:$0xff]   ;;  %v40_v33 = vsub.s32 0, %v39_v32  ;;  %v44_v35 = vsub.s32 1, %v39_v32 }
  0x15   :  { %v503_v27 = vld [vmem:[%s697_s3 + $0x48] sm:$0xff]   ;;  %v505_v29 = vld [vmem:[%s697_s3 + $0x40] sm:$0xff]  }
  0x16   :  { %v504_v28 = vld [vmem:[%s697_s3 + $0x8] sm:$0xff]   ;;  %v506_v30 = vld [vmem:[%s697_s3] sm:$0xff]  }
  0x17   :  { %450 = vmatpush3.bf16.msra.mxu1 %v494_v18  ;;  %v36_v34 = vld [vmem:[%s696_s2] sm:$0x3] }
  0x18   :  { %451 = vmatprep.subr.bf16.mxu1 %v495_v19  ;;  %v41_v36 = vrot.slane %v36_v34, %v40_v33  ;;  %v45_v37 = vrot.slane %v36_v34, %v44_v35  ;;  %v430_v35 = vld [vmem:[%s698_s4] ss:$0 sm:$0xff]  ;;  %s539_s4 = scalar_lea.vmem %s402_s0, 512 }
  0x19   :  { %p540_p0 = scmp.ne.s32.totalorder %s402_s0, %s539_s4  ;;  %p545_p2 = scmp.lt.s32.totalorder %s539_s4, %s539_s4 }
  0x1a   :  { %421 = vmatmul.mubr.msk.bf16.gmra.mxu0 %vm88_vm0, %v27_v14 }
  0x1b   :  { %452 = vmatpush3.bf16.msra.mxu1 %v496_v20  ;;  %p546_p3 = por %p545_p2, %p544_p1 }
  0x1c   :  { %453 = vmatprep.subr.bf16.mxu1 %v497_v21 }
  0x1d   :  { %p547_p4 = pnand %p546_p3, %p540_p0 }
  0x1f   :  { %454 = vmatpush3.bf16.msra.mxu1 %v498_v22 }
  0x20   :  { %455 = vmatprep.subr.bf16.mxu1 %v499_v23 }
  0x23   :  { %456 = vmatpush3.bf16.msra.mxu1 %v500_v24 }
  0x24   :  { %457 = vmatprep.subr.bf16.mxu1 %v501_v25 }
  0x27   :  { %458 = vmatpush3.bf16.msra.mxu1 %v502_v26 }
  0x28   :  { %459 = vmatprep.subr.bf16.mxu1 %v503_v27 }
  0x2b   :  { %460 = vmatpush3.bf16.msra.mxu1 %v504_v28 }
  0x2c   :  { %461 = vmatprep.subr.bf16.mxu1 %v505_v29 }
  0x2f   :  { %462 = vmatpush3.bf16.msra.mxu1 %v506_v30 }
  0xd2   :  { %v129_v38 = vpop.f32.mrf.mxu0 }
  0xd3   :  { %v130_v39 = vadd.f32 %v129_v38, %v41_v36 }
  0xd4   :  { %v131_v40 = vpop.f32.mrf.mxu0 }
  0xd5   :  { %v422_v41 = vmul.f32 -1.442695, %v130_v39  ;;  %v132_v42 = vadd.f32 %v131_v40, %v45_v37 }
  0xd6   :  { %v133_v43 = vpop.f32.mrf.mxu0 }
  0xd7   :  { %v423_v44 = vmul.f32 -1.442695, %v132_v42  ;;  %v134_v45 = vadd.f32 %v133_v43, %v41_v36  ;;  %507 = vpow2.f32 %v422_v41 }
  0xd8   :  { %v135_v46 = vpop.f32.mrf.mxu0 }
  0xd9   :  { %509 = vpow2.f32 %v423_v44  ;;  %v424_v47 = vmul.f32 -1.442695, %v134_v45  ;;  %v136_v48 = vadd.f32 %v135_v46, %v45_v37 }
  0xda   :  { %v139_v49 = vpop.f32.mrf.mxu0 }
  0xdb   :  { %511 = vpow2.f32 %v424_v47  ;;  %v425_v50 = vmul.f32 -1.442695, %v136_v48  ;;  %v140_v51 = vadd.f32 %v139_v49, %v41_v36 }
  0xdc   :  { %v141_v52 = vpop.f32.mrf.mxu0 }
  0xdd   :  { %513 = vpow2.f32 %v425_v50  ;;  %v426_v53 = vmul.f32 -1.442695, %v140_v51  ;;  %v142_v54 = vadd.f32 %v141_v52, %v45_v37 }
  0xde   :  { %v143_v55 = vpop.f32.mrf.mxu0 }
  0xdf   :  { %v427_v56 = vmul.f32 -1.442695, %v142_v54  ;;  %v144_v57 = vadd.f32 %v143_v55, %v41_v36  ;;  %515 = vpow2.f32 %v426_v53 }
  0xe0   :  { %v145_v58 = vpop.f32.mrf.mxu0 }
  0xe1   :  { %517 = vpow2.f32 %v427_v56  ;;  %v428_v59 = vmul.f32 -1.442695, %v144_v57  ;;  %v146_v60 = vadd.f32 %v145_v58, %v45_v37 }
  0xe3   :  { %519 = vpow2.f32 %v428_v59  ;;  %v429_v61 = vmul.f32 -1.442695, %v146_v60 }
  0xe4   :  { %v508_v62 = vpop.eup %507 }
  0xe5   :  { %521 = vpow2.f32 %v429_v61  ;;  %v172_v2 = vadd.f32 1.0, %v508_v62 }
  0xe6   :  { %v510_v63 = vpop.eup %509 }
  0xe7   :  { %v173_v0 = vadd.f32 1.0, %v510_v63 }
  0xe8   :  { %v512_v1 = vpop.eup %511 }
  0xe9   :  { %v174_v3 = vadd.f32 1.0, %v512_v1  ;;  %523 = vrcp.f32 %v173_v0 }
  0xea   :  { %v514_v4 = vpop.eup %513 }
  0xeb   :  { %525 = vrcp.f32 %v174_v3  ;;  %v175_v5 = vadd.f32 1.0, %v514_v4 }
  0xec   :  { %527 = vrcp.f32 %v172_v2  ;;  %v516_v6 = vpop.eup %515 }
  0xed   :  { %529 = vrcp.f32 %v175_v5  ;;  %v176_v10 = vadd.f32 1.0, %v516_v6 }
  0xee   :  { %v518_v7 = vpop.eup %517 }
  0xef   :  { %v177_v8 = vadd.f32 1.0, %v518_v7 }
  0xf0   :  { %v520_v9 = vpop.eup %519 }
  0xf1   :  { %v178_v11 = vadd.f32 1.0, %v520_v9  ;;  %531 = vrcp.f32 %v177_v8 }
  0xf2   :  { %v522_v12 = vpop.eup %521 }
  0xf3   :  { %533 = vrcp.f32 %v178_v11  ;;  %v179_v13 = vadd.f32 1.0, %v522_v12 }
  0xf4   :  { %535 = vrcp.f32 %v176_v10 }
  0xf5   :  { %537 = vrcp.f32 %v179_v13 }
  0xf6   :  { %v524_v14 = vpop.eup %523 }
  0xf7   :  { %v197_v19 = vmul.f32 %v524_v14, %v132_v42 }
  0xf8   :  { %v526_v15 = vpop.eup %525 }
  0xf9   :  { %v528_v16 = vpop.eup %527  ;;  %v198_v18 = vmul.f32 %v526_v15, %v134_v45 }
  0xfa   :  { %v530_v17 = vpop.eup %529  ;;  %v196_v21 = vmul.f32 %v528_v16, %v130_v39 }
  0xfb   :  { %v199_v20 = vmul.f32 %v530_v17, %v136_v48 }
  0xfc   :  { %v204_v23 = vpack.c.bf16 %v198_v18, %v196_v21 }
  0xfd   :  { %v205_v22 = vpack.c.bf16 %v199_v20, %v197_v19 }
  0xfe   :  { %v532_v24 = vpop.eup %531 }
  0xff   :  { %375 = vmatprep.mubr.bf16.mxu1 %v205_v22  ;;  %v201_v29 = vmul.f32 %v532_v24, %v142_v54 }
 0x100   :  { %v534_v25 = vpop.eup %533  ;;  %376 = vmatmul.mubr.bf16.vlgmr.msra.gmra.mxu1 %v204_v23 }
 0x101   :  { %v536_v26 = vpop.eup %535  ;;  %v202_v28 = vmul.f32 %v534_v25, %v144_v57 }
 0x102   :  { %v538_v27 = vpop.eup %537  ;;  %v200_v31 = vmul.f32 %v536_v26, %v140_v51 }
 0x103   :  { %v203_v30 = vmul.f32 %v538_v27, %v146_v60 }
 0x104   :  { %v206_v33 = vpack.c.bf16 %v202_v28, %v200_v31 }
 0x105   :  { %v207_v32 = vpack.c.bf16 %v203_v30, %v201_v29 }
 0x107   :  { %383 = vmatprep.mubr.bf16.mxu1 %v207_v32 }
 0x108   :  { %384 = vmatmul.mubr.bf16.gmra.mxu1 %v206_v33 }
 0x1c0   :  { %v463_v34 = vpop.f32.mrf.mxu1 }
 0x1c2   :  { %v464_v36 = vpop.f32.mrf.mxu1 }
 0x1c3   :  { %v465_v37 = vadd.f32 %v464_v36, %v463_v34 }
 0x1c4   :  { %v466_v38 = vpop.f32.mrf.mxu1 }
 0x1c5   :  { %v378_v39 = vadd.f32 %v465_v37, %v430_v35 }
 0x1c6   :  { %v467_v40 = vpop.f32.mrf.mxu1 }
 0x1c7   :  { %392 = vst.msk [vmem:[#allocation2] sm:$0xff] %vm88_vm0, %v378_v39  ;;  %v468_v41 = vadd.f32 %v467_v40, %v466_v38 }
 0x1c8   :  { %v469_v42 = vpop.f32.mrf.mxu1 }
 0x1c9   :  { %v381_v43 = vadd.f32 %v468_v41, %v430_v35 }
 0x1ca   :  { %v470_v44 = vpop.f32.mrf.mxu1 }
 0x1cb   :  { %393 = vst.msk [vmem:[#allocation2 + $0x8] sm:$0xff] %vm88_vm0, %v381_v43  ;;  %v471_v45 = vadd.f32 %v470_v44, %v469_v42 }
 0x1cc   :  { %v472_v46 = vpop.f32.mrf.mxu1 }
 0x1cd   :  { %v386_v47 = vadd.f32 %v471_v45, %v430_v35 }
 0x1ce   :  { %v473_v48 = vpop.f32.mrf.mxu1 }
 0x1cf   :  { %394 = vst.msk [vmem:[#allocation2 + $0x10] sm:$0xff] %vm88_vm0, %v386_v47  ;;  %v474_v49 = vadd.f32 %v473_v48, %v472_v46 }
 0x1d1   :  { %v389_v50 = vadd.f32 %v474_v49, %v430_v35 }
 0x1d3   :  { %395 = vst.msk [vmem:[#allocation2 + $0x18] sm:$0xff] %vm88_vm0, %v389_v50 }
 0x1d4   :  { %550 = shalt.err (!%p547_p4)
}
 0x1d5   :  { %s563_s24 = smov 128   ;;  %s564_s25 = smov 8  }
 0x1d6   :  { %407 = dma.vmem_to_hbm [thread:$0]  %s402_s0, 512, %s699_s5, [#allocation3], %s563_s24, %s563_s24, %s564_s25  }
 0x1d7   :  { %559 = dma.done.wait [#allocation3], 512  }
 0x1d8   :  { %560 = vsyncadd [#allocation3], 4294966784 }
 0x1d9   :  { %411 = vsyncpa [#allocation3], 1 }

</bundles_post_ra>
